<compile_context>
chip_gen: v7x
topology: tpu7x:2x2x1
jax: 0.10.0
libtpu: 0.0.40
codegen_flags: <defaults>
</compile_context>

<pallas_src>
import math

import jax
import jax.numpy as jnp
from jax.experimental import pallas as pl
from jax.experimental.pallas import tpu as pltpu


# ~2 MiB per output tile: measured tiled-copy data only reaches ~85%+ of the
# HBM roofline once tiles are >= ~1 MiB (per-grid-step overhead ~0.35 us).
_TARGET_TILE_BYTES = 2 * 1024 * 1024

# Conservative budget for the double-buffered footprint (~4x the output tile
# bytes: 2 buffers for the inputs' tiles + 2 for the output tile).  Kept under
# the smallest scoped-VMEM default (16 MiB on v5e) and far inside v7x's
# 64 MiB-per-TC physical VMEM.
_VMEM_BUDGET_BYTES = 12 * 1024 * 1024


def _cat_rows_kernel(*refs):
    """refs = (*input_refs, out_ref); each is a (TILE_R, W_i) VMEM tile.

    Build the full-width output tile once and store it lane-dense: one
    unmasked full-width vector store per sublane row instead of N masked
    partial stores at odd lane offsets.
    """
    out_ref = refs[-1]
    in_refs = refs[:-1]
    out_ref[:, :] = jnp.concatenate([r[:, :] for r in in_refs], axis=-1)


def _sublane_granularity(itemsize):
    # f32 -> 8, bf16 -> 16, int8/fp8 -> 32 (sub-32-bit dtypes pack along
    # sublanes, so keep row tiles a multiple of the packed granularity).
    return max(8, 32 // max(1, itemsize))


def _pick_tile_rows(rows, w_out, itemsize):
    """Row tile sized by bytes (~_TARGET_TILE_BYTES per output tile), clamped
    by the double-buffered VMEM budget, rounded to the sublane granularity,
    and capped so the grid has >= 2 steps whenever possible (v7x megacore)."""
    gran = _sublane_granularity(itemsize)
    if rows <= gran:
        # Single block spanning all rows (block dim == full array dim is OK).
        return rows

    bytes_per_row = max(1, w_out * itemsize)
    target_rows = max(gran, _TARGET_TILE_BYTES // bytes_per_row)
    max_rows_by_vmem = max(gran, _VMEM_BUDGET_BYTES // (4 * bytes_per_row))

    tile_r = min(rows, target_rows, max_rows_by_vmem)
    tile_r = max(gran, (tile_r // gran) * gran)

    # Guarantee at least 2 grid steps so dimension_semantics=("parallel",)
    # can shard the copy across v7x's two TensorCores (no-op on v5e/v6e).
    if rows >= 2 * gran:
        tile_r = min(tile_r, max(gran, ((rows // 2) // gran) * gran))
    return tile_r


def pallas_cat(xs):
    """Concatenate a sequence of arrays along the last axis (== torch.cat(x, -1))."""
    xs = list(xs)
    assert len(xs) >= 1
    if len(xs) == 1:
        return xs[0]

    lead = xs[0].shape[:-1]
    dtype = xs[0].dtype
    for x in xs:
        assert x.shape[:-1] == lead, "all non-concat dims must match"
        assert x.dtype == dtype, "all dtypes must match"

    widths = [int(x.shape[-1]) for x in xs]
    w_out = sum(widths)
    out_shape = lead + (w_out,)

    rows = int(math.prod(lead)) if lead else 1
    xs2d = [x.reshape(rows, w) for x, w in zip(xs, widths)]

    itemsize = jnp.dtype(dtype).itemsize
    tile_r = _pick_tile_rows(rows, w_out, itemsize)
    grid = (pl.cdiv(rows, tile_r),)  # ragged last block handled by Pallas

    in_specs = [pl.BlockSpec((tile_r, w), lambda i: (i, 0)) for w in widths]
    out_specs = pl.BlockSpec((tile_r, w_out), lambda i: (i, 0))

    out2d = pl.pallas_call(
        _cat_rows_kernel,
        out_shape=jax.ShapeDtypeStruct((rows, w_out), dtype),
        grid_spec=pltpu.PrefetchScalarGridSpec(
            num_scalar_prefetch=0,
            grid=grid,
            in_specs=in_specs,
            out_specs=out_specs,
        ),
        compiler_params=pltpu.CompilerParams(
            # Row tiles are independent -> shard across v7x's 2 TCs.
            dimension_semantics=("parallel",),
        ),
    )(*xs2d)

    return out2d.reshape(out_shape)


def _check(xs, label):
    out = jax.block_until_ready(pallas_cat(xs))
    ref = jnp.concatenate(xs, axis=-1)
    assert out.shape == ref.shape, (label, out.shape, ref.shape)
    assert jnp.array_equal(out, ref), f"mismatch vs reference concatenate ({label})"


if __name__ == "__main__":
    key = jax.random.PRNGKey(0)
    keys = jax.random.split(key, 9)

    # 1) NCHW-style inputs (the module's typical use), non-128-aligned widths.
    #    rows = 2*4*16 = 128 -> 2-step pipelined grid.
    a = jax.random.normal(keys[0], (2, 4, 16, 16), dtype=jnp.float32)
    b = jax.random.normal(keys[1], (2, 4, 16, 8), dtype=jnp.float32)
    c = jax.random.normal(keys[2], (2, 4, 16, 4), dtype=jnp.float32)
    _check([a, b, c], "nchw f32")

    # 2) Ragged last block: rows = 2*5*100 = 1000 -> tile 496, grid 3.
    d = jax.random.normal(keys[3], (2, 5, 100, 32), dtype=jnp.float32)
    e = jax.random.normal(keys[4], (2, 5, 100, 96), dtype=jnp.float32)
    _check([d, e], "ragged rows f32")

    # 3) Rows not a multiple of the sublane granularity (105 rows).
    f = jax.random.normal(keys[5], (3, 5, 7, 40), dtype=jnp.float32)
    g = jax.random.normal(keys[6], (3, 5, 7, 24), dtype=jnp.float32)
    _check([f, g], "odd rows f32")

    # 4) Packed dtype (bf16, 16-row sublane granularity).
    h = jax.random.normal(keys[7], (2, 4, 16, 16), dtype=jnp.bfloat16)
    i = jax.random.normal(keys[8], (2, 4, 16, 48), dtype=jnp.bfloat16)
    _check([h, i], "bf16")

    print("KERNEL_OK")
</pallas_src>

<mosaic_0001>
module attributes {stable_mosaic.version = 11 : i64} {
  func.func @_cat_rows_kernel(%arg0: i32, %arg1: memref<64x16xf32, #tpu.memory_space<vmem>>, %arg2: memref<64x8xf32, #tpu.memory_space<vmem>>, %arg3: memref<64x4xf32, #tpu.memory_space<vmem>>, %arg4: memref<64x28xf32, #tpu.memory_space<vmem>>) attributes {dimension_semantics = [#tpu.dimension_semantics<parallel>], iteration_bounds = array<i64: 2>, scalar_prefetch = 0 : i64, scratch_operands = 0 : i64, tpu.core_type = #tpu.core_type<tc>, window_params = [{transform_indices = @transform_0, window_bounds = array<i64: 64, 16>}, {transform_indices = @transform_1, window_bounds = array<i64: 64, 8>}, {transform_indices = @transform_2, window_bounds = array<i64: 64, 4>}, {transform_indices = @transform_3, window_bounds = array<i64: 64, 28>}]} {
    %c0 = arith.constant 0 : index
    %c0_0 = arith.constant 0 : index
    %0 = vector.load %arg1[%c0, %c0_0] : memref<64x16xf32, #tpu.memory_space<vmem>>, vector<64x16xf32>
    %c0_1 = arith.constant 0 : index
    %c0_2 = arith.constant 0 : index
    %1 = vector.load %arg2[%c0_1, %c0_2] : memref<64x8xf32, #tpu.memory_space<vmem>>, vector<64x8xf32>
    %c0_3 = arith.constant 0 : index
    %c0_4 = arith.constant 0 : index
    %2 = vector.load %arg3[%c0_3, %c0_4] : memref<64x4xf32, #tpu.memory_space<vmem>>, vector<64x4xf32>
    %3 = tpu.concatenate %0, %1, %2 in 1 : vector<64x16xf32>, vector<64x8xf32>, vector<64x4xf32> -> vector<64x28xf32>
    %c0_5 = arith.constant 0 : index
    %c0_6 = arith.constant 0 : index
    %4 = vector.load %arg4[%c0_5, %c0_6] : memref<64x28xf32, #tpu.memory_space<vmem>>, vector<64x28xf32>
    tpu.vector_store %arg4[%c0_5, %c0_6], %3 {strides = array<i32>} : memref<64x28xf32, #tpu.memory_space<vmem>>, vector<64x28xf32>,
    return
  }
  func.func @transform_0(%arg0: i32) -> (i32, i32) {
    %c0_i32 = arith.constant 0 : i32
    %c0_i32_0 = arith.constant 0 : i32
    return %arg0, %c0_i32 : i32, i32
  }
  func.func @transform_1(%arg0: i32) -> (i32, i32) {
    %c0_i32 = arith.constant 0 : i32
    %c0_i32_0 = arith.constant 0 : i32
    return %arg0, %c0_i32 : i32, i32
  }
  func.func @transform_2(%arg0: i32) -> (i32, i32) {
    %c0_i32 = arith.constant 0 : i32
    %c0_i32_0 = arith.constant 0 : i32
    return %arg0, %c0_i32 : i32, i32
  }
  func.func @transform_3(%arg0: i32) -> (i32, i32) {
    %c0_i32 = arith.constant 0 : i32
    %c0_i32_0 = arith.constant 0 : i32
    return %arg0, %c0_i32 : i32, i32
  }
}

</mosaic_0001>

<bundles_post_ra>
// kernel: tpu_custom_call.1
= control target key start
LH: loop header
LB: loop body
LE: loop exit
PB: predicated region body
PF: predicated region fallthrough
CT: control target
= control target key end

     0   :  { %s468_s12 = smov 0   ;;  %s541_s0 = inlined_call_operand.vmem [shape: f32[128,16], index: 0, kind: input, shape index: {}]   ;;  %s542_s1 = inlined_call_operand.vmem [shape: f32[128,8], index: 1, kind: input, shape index: {}]   ;;  %s543_s2 = inlined_call_operand.vmem [shape: f32[128,4], index: 2, kind: input, shape index: {}]   ;;  %s544_s3 = inlined_call_operand.vmem [shape: f32[128,28], index: 3, kind: output, shape index: {}]  }
   0x1 LB: > { %s413_s13 = sadd.s32 4294967295, %s444_s12   ;;  %p417_p0 = scmp.ge.s32.totalorder %s444_s12, 1  ;;  %s444_s12 = sphi %s468_s12, %s13_s12  }
   0x2   : > { %p160_p1 = scmp.lt.s32.totalorder %s444_s12, 3 }
   0x4   : > { %p161_p2 = pnand %p417_p0, %p160_p1 }
   0x5   : > { %s418_s14 = sshll.u32 (!%p161_p2), %s413_s13, 3  ;;  %s446_s19 = smov (!%p161_p2), 16   ;;  %vm306_vm0 = vcmask (!%p161_p2), 130048   ;;  %vm315_vm1 = vcmask (!%p161_p2), 195584   ;;  %vm324_vm2 = vcmask (!%p161_p2), 228352  }
   0x6   : > { %164 = sbr.rel (%p161_p2) target bundleno = 162 (0xa2), region = 32  ;;  %p195_p3 = scmp.lt.s32.totalorder (!%p161_p2), %s418_s14, 15 }
   0x7   : > { %s447_s23 = smov (!%p161_p2), 24  }
   0xd   : > { %s546_s14 = smov (!%p195_p3, %s418_s14), 15 }
   0xe   : > { %s476_s15 = sshll.u32 %s546_s14, 3 }
   0xf   : > { %s204_s18 = scalar_lea.vmem %s542_s1, %s476_s15  ;;  %s210_s22 = scalar_lea.vmem %s543_s2, %s476_s15 }
  0x10   : > { %v228_v0 = vld [vmem:[%s204_s18 + $0x10] sm:$0xff]  ;;  %v226_v1 = vld [vmem:[%s204_s18] sm:$0xff]  ;;  %v229_v2 = vld [vmem:[%s204_s18 + $0x18] sm:$0xff]  ;;  %s490_s26 = scalar_lea.vmem %s541_s0, %s476_s15  ;;  %s498_s29 = scalar_lea.vmem %s544_s3, %s476_s15 }
  0x11   : > { %254 = vrot.lane.b32.xlu1 %v228_v0, %s446_s19  ;;  %250 = vrot.lane.b32.xlu0 %v226_v1, %s446_s19  ;;  %v227_v3 = vld [vmem:[%s204_s18 + $0x8] sm:$0xff]  ;;  %v230_v5 = vld [vmem:[%s204_s18 + $0x20] sm:$0xff] }
  0x12   : > { %v231_v4 = vld [vmem:[%s204_s18 + $0x28] sm:$0xff]  ;;  %v233_v6 = vld [vmem:[%s204_s18 + $0x38] sm:$0xff]  ;;  %v232_v7 = vld [vmem:[%s204_s18 + $0x30] sm:$0xff] }
  0x13   : > { %v235_v8 = vld [vmem:[%s210_s22 + $0x8] sm:$0xff]  ;;  %v234_v9 = vld [vmem:[%s210_s22] sm:$0xff]  ;;  %v237_v10 = vld [vmem:[%s210_s22 + $0x18] sm:$0xff] }
  0x14   : > { %v236_v11 = vld [vmem:[%s210_s22 + $0x10] sm:$0xff]  ;;  %v239_v12 = vld [vmem:[%s210_s22 + $0x28] sm:$0xff]  ;;  %v238_v13 = vld [vmem:[%s210_s22 + $0x20] sm:$0xff] }
  0x15   : > { %256 = vrot.lane.b32.xlu1 %v229_v2, %s446_s19  ;;  %252 = vrot.lane.b32.xlu0 %v227_v3, %s446_s19  ;;  %v241_v14 = vld [vmem:[%s210_s22 + $0x38] sm:$0xff]  ;;  %v240_v15 = vld [vmem:[%s210_s22 + $0x30] sm:$0xff] }
  0x16   : > { %v218_v24 = vld [vmem:[%s490_s26] sm:$0xff]  ;;  %v219_v25 = vld [vmem:[%s490_s26 + $0x8] sm:$0xff]  ;;  %v220_v30 = vld [vmem:[%s490_s26 + $0x10] sm:$0xff] }
  0x17   : > { %v221_v31 = vld [vmem:[%s490_s26 + $0x18] sm:$0xff]  ;;  %v223_v38 = vld [vmem:[%s490_s26 + $0x28] sm:$0xff]  ;;  %v222_v39 = vld [vmem:[%s490_s26 + $0x20] sm:$0xff] }
  0x18   : > { %v225_v46 = vld [vmem:[%s490_s26 + $0x38] sm:$0xff]  ;;  %v224_v47 = vld [vmem:[%s490_s26 + $0x30] sm:$0xff] }
  0x19   : > { %260 = vrot.lane.b32.xlu1 %v231_v4, %s446_s19  ;;  %258 = vrot.lane.b32.xlu0 %v230_v5, %s446_s19 }
  0x1d   : > { %264 = vrot.lane.b32.xlu1 %v233_v6, %s446_s19  ;;  %262 = vrot.lane.b32.xlu0 %v232_v7, %s446_s19 }
  0x21   : > { %284 = vrot.lane.b32.xlu1 %v235_v8, %s447_s23  ;;  %282 = vrot.lane.b32.xlu0 %v234_v9, %s447_s23 }
  0x25   : > { %288 = vrot.lane.b32.xlu1 %v237_v10, %s447_s23  ;;  %286 = vrot.lane.b32.xlu0 %v236_v11, %s447_s23 }
  0x29   : > { %292 = vrot.lane.b32.xlu1 %v239_v12, %s447_s23  ;;  %290 = vrot.lane.b32.xlu0 %v238_v13, %s447_s23 }
  0x2d   : > { %296 = vrot.lane.b32.xlu1 %v241_v14, %s447_s23  ;;  %294 = vrot.lane.b32.xlu0 %v240_v15, %s447_s23 }
  0x83   : > { %v255_v16 = vpop.permute.xlu1 %254  ;;  %v251_v17 = vpop.permute.xlu0 %250 }
  0x84   : > { %v307_v26 = vsel %vm306_vm0, %v218_v24, %v251_v17  ;;  %v309_v34 = vsel %vm306_vm0, %v220_v30, %v255_v16 }
  0x87   : > { %v257_v18 = vpop.permute.xlu1 %256  ;;  %v253_v19 = vpop.permute.xlu0 %252 }
  0x88   : > { %v308_v27 = vsel %vm306_vm0, %v219_v25, %v253_v19  ;;  %v310_v35 = vsel %vm306_vm0, %v221_v31, %v257_v18 }
  0x8b   : > { %v261_v20 = vpop.permute.xlu1 %260  ;;  %v259_v21 = vpop.permute.xlu0 %258 }
  0x8c   : > { %v312_v42 = vsel %vm306_vm0, %v223_v38, %v261_v20  ;;  %v311_v43 = vsel %vm306_vm0, %v222_v39, %v259_v21 }
  0x8f   : > { %v265_v22 = vpop.permute.xlu1 %264  ;;  %v263_v23 = vpop.permute.xlu0 %262 }
  0x90   : > { %v314_v50 = vsel %vm306_vm0, %v225_v46, %v265_v22  ;;  %v313_v51 = vsel %vm306_vm0, %v224_v47, %v263_v23 }
  0x93   : > { %v285_v28 = vpop.permute.xlu1 %284  ;;  %v283_v29 = vpop.permute.xlu0 %282 }
  0x94   : > { %v317_v32 = vsel %vm315_vm1, %v308_v27, %v285_v28  ;;  %v316_v33 = vsel %vm315_vm1, %v307_v26, %v283_v29 }
  0x95   : > { %326 = vst.msk [vmem:[%s498_s29 + $0x8] sm:$0xff] %vm324_vm2, %v317_v32  ;;  %325 = vst.msk [vmem:[%s498_s29] sm:$0xff] %vm324_vm2, %v316_v33 }
  0x97   : > { %v289_v36 = vpop.permute.xlu1 %288  ;;  %v287_v37 = vpop.permute.xlu0 %286 }
  0x98   : > { %v319_v40 = vsel %vm315_vm1, %v310_v35, %v289_v36  ;;  %v318_v41 = vsel %vm315_vm1, %v309_v34, %v287_v37 }
  0x99   : > { %328 = vst.msk [vmem:[%s498_s29 + $0x18] sm:$0xff] %vm324_vm2, %v319_v40  ;;  %327 = vst.msk [vmem:[%s498_s29 + $0x10] sm:$0xff] %vm324_vm2, %v318_v41 }
  0x9b   : > { %v293_v44 = vpop.permute.xlu1 %292  ;;  %v291_v45 = vpop.permute.xlu0 %290 }
  0x9c   : > { %v321_v48 = vsel %vm315_vm1, %v312_v42, %v293_v44  ;;  %v320_v49 = vsel %vm315_vm1, %v311_v43, %v291_v45 }
  0x9d   : > { %330 = vst.msk [vmem:[%s498_s29 + $0x28] sm:$0xff] %vm324_vm2, %v321_v48  ;;  %329 = vst.msk [vmem:[%s498_s29 + $0x20] sm:$0xff] %vm324_vm2, %v320_v49 }
  0x9f   : > { %v297_v52 = vpop.permute.xlu1 %296  ;;  %v295_v53 = vpop.permute.xlu0 %294 }
  0xa0   : > { %v323_v54 = vsel %vm315_vm1, %v314_v50, %v297_v52  ;;  %v322_v55 = vsel %vm315_vm1, %v313_v51, %v295_v53 }
  0xa1   : > { %332 = vst.msk [vmem:[%s498_s29 + $0x38] sm:$0xff] %vm324_vm2, %v323_v54  ;;  %331 = vst.msk [vmem:[%s498_s29 + $0x30] sm:$0xff] %vm324_vm2, %v322_v55 }
  0xa2 PF: > { %s13_s12 = sadd.s32 1, %s444_s12  }
  0xa3   : > { %p10_p4 = scmp.ge.s32.totalorder %s13_s12, 4  }
  0xa5   :  { %12 = sbr.rel (!%p10_p4) target bundleno = 1 (0x1), region = 68 }

</bundles_post_ra>
